<compile_context>
chip_gen: v6e
topology: v6e:2x2x1
jax: 0.10.0
libtpu: 0.0.40
codegen_flags: <defaults>
</compile_context>

<pallas_src>
import functools

import numpy as np
import jax
import jax.numpy as jnp
from jax import lax
from jax.experimental import pallas as pl
from jax.experimental.pallas import tpu as pltpu


def gaussian_taps_1d(kernel_size: int) -> np.ndarray:
    """1-D taps v such that outer(v, v) == scipy.ndimage.gaussian_filter(delta_KxK, sigma),
    i.e. exactly the (separable) kernel built by GaussianBlurLayer._init_kernel."""
    assert kernel_size % 2 == 1
    sigma = 0.3 * ((kernel_size - 1) * 0.5 - 1) + 0.8
    truncate = 4.0
    radius = int(truncate * sigma + 0.5)
    x = np.arange(-radius, radius + 1, dtype=np.float64)
    w = np.exp(-0.5 * (x / sigma) ** 2)
    w /= w.sum()
    delta = np.zeros(kernel_size, dtype=np.float64)
    delta[kernel_size // 2] = 1.0
    padded = np.pad(delta, radius, mode="symmetric")  # numpy 'symmetric' == scipy 'reflect'
    v = np.array(
        [np.dot(padded[j : j + 2 * radius + 1], w) for j in range(kernel_size)]
    )
    return v


def _blur_kernel(x_ref, o_ref, *, taps, H, W):
    """x_ref, o_ref: (Bn, H, W) blocks. Fused reflection pad + separable Gaussian."""
    K = len(taps)
    p = K // 2
    x = x_ref[...].astype(jnp.float32)

    # ---- vertical: fused ReflectionPad rows + 1-D pass (K MACs) ----
    if p:
        top = [x[:, p - i : p - i + 1, :] for i in range(p)]        # rows p, p-1, ..., 1
        bot = [x[:, H - 2 - i : H - 1 - i, :] for i in range(p)]    # rows H-2, ..., H-1-p
        xv = jnp.concatenate(top + [x] + bot, axis=1)               # (Bn, H+2p, W)
    else:
        xv = x
    v = taps[0] * xv[:, 0:H, :]
    for d in range(1, K):
        v = v + taps[d] * xv[:, d : d + H, :]

    # ---- horizontal: fused ReflectionPad cols + 1-D pass (K MACs) ----
    if p:
        left = [v[:, :, p - j : p - j + 1] for j in range(p)]       # cols p, ..., 1
        right = [v[:, :, W - 2 - j : W - 1 - j] for j in range(p)]  # cols W-2, ..., W-1-p
        vh = jnp.concatenate(left + [v] + right, axis=2)            # (Bn, H, W+2p)
    else:
        vh = v
    out = taps[0] * vh[:, :, 0:W]
    for d in range(1, K):
        out = out + taps[d] * vh[:, :, d : d + W]

    o_ref[...] = out.astype(o_ref.dtype)


def _choose_block_planes(nc, h, w, target_bytes=2 << 20):
    """Pack as many planes per block as fits ~target_bytes, keep >=2 grid steps,
    and make the plane count an exact divisor of N*C."""
    per_plane = h * w * 4
    bn = max(1, min(nc, max(1, target_bytes // per_plane)))
    if nc >= 2:
        bn = min(bn, max(1, nc // 2))  # >=2 grid steps -> both TCs used on v7x
    while nc % bn:
        bn -= 1
    return bn


def gaussian_blur(x, kernel_size: int):
    """Equivalent of GaussianBlurLayer(channels=C, kernel_size).forward(x), x: (N,C,H,W)."""
    N, C, H, W = x.shape
    K = int(kernel_size)
    assert K % 2 == 1
    p = K // 2
    assert H > p and W > p, "ReflectionPad2d requires pad < input size"

    taps = tuple(float(t) for t in gaussian_taps_1d(K))

    nc = N * C
    xs = x.reshape(nc, H, W)                  # free reshape, no HBM traffic
    bn = _choose_block_planes(nc, H, W)
    grid = (nc // bn,)

    block_bytes = bn * H * W * 4
    vmem_limit = int(min(max(32 << 20, 12 * block_bytes), 56 << 20))

    # TODO(synk): for very large planes (several MiB each) tile H with a p-row halo
    # instead of whole-plane blocks so the working set stays inside v7x's 64 MiB VMEM.
    kern = functools.partial(_blur_kernel, taps=taps, H=H, W=W)
    out = pl.pallas_call(
        kern,
        out_shape=jax.ShapeDtypeStruct((nc, H, W), x.dtype),
        grid=grid,
        in_specs=[pl.BlockSpec((bn, H, W), lambda i: (i, 0, 0))],
        out_specs=pl.BlockSpec((bn, H, W), lambda i: (i, 0, 0)),
        compiler_params=pltpu.CompilerParams(
            dimension_semantics=("parallel",),
            vmem_limit_bytes=vmem_limit,
        ),
    )(xs)
    return out.reshape(N, C, H, W)


def _reference(x, kernel_size):
    """Depthwise (groups=C) correlation reference via lax.conv, for validation."""
    N, C, H, W = x.shape
    K = kernel_size
    p = K // 2
    v = gaussian_taps_1d(K)
    k2d = np.outer(v, v).astype(np.float32)
    xp = jnp.pad(x, ((0, 0), (0, 0), (p, p), (p, p)), mode="reflect")
    rhs = jnp.broadcast_to(jnp.asarray(k2d), (C, 1, K, K))
    return lax.conv_general_dilated(
        xp, rhs, window_strides=(1, 1), padding="VALID",
        dimension_numbers=("NCHW", "OIHW", "NCHW"), feature_group_count=C,
    )


if __name__ == "__main__":
    N, C, H, W = 2, 4, 16, 16
    kernel_size = 3

    key = jax.random.PRNGKey(0)
    x = jax.random.normal(key, (N, C, H, W), dtype=jnp.float32)

    y = jax.block_until_ready(gaussian_blur(x, kernel_size))
    y_ref = jax.block_until_ready(_reference(x, kernel_size))
    np.testing.assert_allclose(np.asarray(y), np.asarray(y_ref), atol=1e-5, rtol=1e-5)

    print("KERNEL_OK")
</pallas_src>

<mosaic_0001>
module attributes {stable_mosaic.version = 11 : i64} {
  func.func @_blur_kernel(%arg0: i32, %arg1: memref<4x16x16xf32, #tpu.memory_space<vmem>>, %arg2: memref<4x16x16xf32, #tpu.memory_space<vmem>>) attributes {dimension_semantics = [#tpu.dimension_semantics<parallel>], iteration_bounds = array<i64: 2>, scalar_prefetch = 0 : i64, scratch_operands = 0 : i64, tpu.core_type = #tpu.core_type<tc>, window_params = [{transform_indices = @transform_0, window_bounds = array<i64: 4, 16, 16>}, {transform_indices = @transform_1, window_bounds = array<i64: 4, 16, 16>}]} {
    %c0 = arith.constant 0 : index
    %c0_0 = arith.constant 0 : index
    %c0_1 = arith.constant 0 : index
    %0 = vector.load %arg1[%c0, %c0_0, %c0_1] : memref<4x16x16xf32, #tpu.memory_space<vmem>>, vector<4x16x16xf32>
    %1 = vector.extract_strided_slice %0 {offsets = [0, 1, 0], sizes = [4, 1, 16], strides = [1, 1, 1]} : vector<4x16x16xf32> to vector<4x1x16xf32>
    %2 = vector.extract_strided_slice %0 {offsets = [0, 14, 0], sizes = [4, 1, 16], strides = [1, 1, 1]} : vector<4x16x16xf32> to vector<4x1x16xf32>
    %3 = tpu.concatenate %1, %0, %2 in 1 : vector<4x1x16xf32>, vector<4x16x16xf32>, vector<4x1x16xf32> -> vector<4x18x16xf32>
    %4 = vector.extract_strided_slice %3 {offsets = [0, 0, 0], sizes = [4, 16, 16], strides = [1, 1, 1]} : vector<4x18x16xf32> to vector<4x16x16xf32>
    %cst = arith.constant 0.250221044 : f32
    %5 = vector.broadcast %cst : f32 to vector<4x16x16xf32>
    %6 = arith.mulf %5, %4 : vector<4x16x16xf32>
    %7 = vector.extract_strided_slice %3 {offsets = [0, 1, 0], sizes = [4, 16, 16], strides = [1, 1, 1]} : vector<4x18x16xf32> to vector<4x16x16xf32>
    %cst_2 = arith.constant 0.499557942 : f32
    %8 = vector.broadcast %cst_2 : f32 to vector<4x16x16xf32>
    %9 = arith.mulf %8, %7 : vector<4x16x16xf32>
    %10 = arith.addf %6, %9 : vector<4x16x16xf32>
    %11 = vector.extract_strided_slice %3 {offsets = [0, 2, 0], sizes = [4, 16, 16], strides = [1, 1, 1]} : vector<4x18x16xf32> to vector<4x16x16xf32>
    %cst_3 = arith.constant 0.250221044 : f32
    %12 = vector.broadcast %cst_3 : f32 to vector<4x16x16xf32>
    %13 = arith.mulf %12, %11 : vector<4x16x16xf32>
    %14 = arith.addf %10, %13 : vector<4x16x16xf32>
    %15 = vector.extract_strided_slice %14 {offsets = [0, 0, 1], sizes = [4, 16, 1], strides = [1, 1, 1]} : vector<4x16x16xf32> to vector<4x16x1xf32>
    %16 = vector.extract_strided_slice %14 {offsets = [0, 0, 14], sizes = [4, 16, 1], strides = [1, 1, 1]} : vector<4x16x16xf32> to vector<4x16x1xf32>
    %17 = tpu.concatenate %15, %14, %16 in 2 : vector<4x16x1xf32>, vector<4x16x16xf32>, vector<4x16x1xf32> -> vector<4x16x18xf32>
    %18 = vector.extract_strided_slice %17 {offsets = [0, 0, 0], sizes = [4, 16, 16], strides = [1, 1, 1]} : vector<4x16x18xf32> to vector<4x16x16xf32>
    %cst_4 = arith.constant 0.250221044 : f32
    %19 = vector.broadcast %cst_4 : f32 to vector<4x16x16xf32>
    %20 = arith.mulf %19, %18 : vector<4x16x16xf32>
    %21 = vector.extract_strided_slice %17 {offsets = [0, 0, 1], sizes = [4, 16, 16], strides = [1, 1, 1]} : vector<4x16x18xf32> to vector<4x16x16xf32>
    %cst_5 = arith.constant 0.499557942 : f32
    %22 = vector.broadcast %cst_5 : f32 to vector<4x16x16xf32>
    %23 = arith.mulf %22, %21 : vector<4x16x16xf32>
    %24 = arith.addf %20, %23 : vector<4x16x16xf32>
    %25 = vector.extract_strided_slice %17 {offsets = [0, 0, 2], sizes = [4, 16, 16], strides = [1, 1, 1]} : vector<4x16x18xf32> to vector<4x16x16xf32>
    %cst_6 = arith.constant 0.250221044 : f32
    %26 = vector.broadcast %cst_6 : f32 to vector<4x16x16xf32>
    %27 = arith.mulf %26, %25 : vector<4x16x16xf32>
    %28 = arith.addf %24, %27 : vector<4x16x16xf32>
    %c0_7 = arith.constant 0 : index
    %c0_8 = arith.constant 0 : index
    %c0_9 = arith.constant 0 : index
    %29 = vector.load %arg2[%c0_7, %c0_8, %c0_9] : memref<4x16x16xf32, #tpu.memory_space<vmem>>, vector<4x16x16xf32>
    tpu.vector_store %arg2[%c0_7, %c0_8, %c0_9], %28 {strides = array<i32>} : memref<4x16x16xf32, #tpu.memory_space<vmem>>, vector<4x16x16xf32>,
    return
  }
  func.func @transform_0(%arg0: i32) -> (i32, i32, i32) {
    %c0_i32 = arith.constant 0 : i32
    %c0_i32_0 = arith.constant 0 : i32
    %c0_i32_1 = arith.constant 0 : i32
    return %arg0, %c0_i32, %c0_i32_0 : i32, i32, i32
  }
  func.func @transform_1(%arg0: i32) -> (i32, i32, i32) {
    %c0_i32 = arith.constant 0 : i32
    %c0_i32_0 = arith.constant 0 : i32
    %c0_i32_1 = arith.constant 0 : i32
    return %arg0, %c0_i32, %c0_i32_0 : i32, i32, i32
  }
}

</mosaic_0001>

<bundles_post_ra>
// kernel: tpu_custom_call.1
= control target key start
LH: loop header
LB: loop body
LE: loop exit
PB: predicated region body
PF: predicated region fallthrough
CT: control target
= control target key end

     0   :  { %6 = vsyncpa [#allocation3], 0  ;;  %s1074_s0 = inlined_call_operand.hbm [shape: f32[8,16,16], index: 0, kind: input, shape index: {}]   ;;  %s1075_s1 = inlined_call_operand.hbm [shape: f32[8,16,16], index: 1, kind: output, shape index: {}]  }
   0x1   :  { %8 = vsyncpa [#allocation3 + $0x1], 0 }
   0x2   :  { %9 = vsyncpa [#allocation4], 0 }
   0x3   :  { %11 = vsyncpa [#allocation4 + $0x1], 0  ;;  %s804_s6 = smov 0   ;;  %s806_s7 = smov 0  }
   0x4   :  { %s808_s8 = smov 0   ;;  %s810_s9 = smov 0  }
   0x5 LB: > { %s825_s10 = sadd.s32 4294967295, %s782_s9   ;;  %s616_s11 = sadd.s32 4294967294, %s782_s9   ;;  %s782_s9 = sphi %s810_s9, %s1090_s9   ;;  %s778_s8 = sphi %s808_s8, %s1089_s8   ;;  %s774_s7 = sphi %s806_s7, %s1088_s7   ;;  %s770_s6 = sphi %s804_s6, %s1087_s6  }
   0x6   : > { %s829_s12 = sadd.s32 1, %s782_s9   ;;  %s24_s13 = sadd.s32 1, %s778_s8 }
   0x7   : > { %s21_s14 = ssub.s32 %s782_s9, %s829_s12  ;;  %p31_p0 = scmp.ne.s32.totalorder %s778_s8, %s774_s7 }
   0x8   : > { %p22_p1 = scmp.eq.s32.totalorder %s21_s14, 0  ;;  %p32_p2 = scmp.eq.s32.totalorder %s782_s9, 0 }
   0x9   : > { %p37_p3 = scmp.ne.s32.totalorder %s774_s7, %s770_s6  ;;  %p38_p4 = scmp.eq.s32.totalorder %s825_s10, 0 }
   0xa   : > { %s841_s15 = scalar_select %p22_p1, %s778_s8, %s24_s13  }
   0xb   : > { %p843_p5 = por %p32_p2, %p31_p0  ;;  %p847_p6 = por %p38_p4, %p37_p3 }
   0xc   : > { %p61_p7 = scmp.eq.s32.totalorder %s825_s10, 1  ;;  %p67_p8 = scmp.eq.s32.totalorder %s616_s11, 1 }
   0xd   : > { %s1079_s17 = scalar_select %p847_p6, 1, 0 }
   0xe   : > { %p648_p10 = scmp.lt.s32.totalorder %s782_s9, 2  ;;  %p854_p11 = por %p61_p7, %p31_p0 }
   0xf   : > { %p858_p12 = por %p67_p8, %p37_p3  ;;  %s87_s20 = sand.u32 1, %s778_s8  }
  0x10   : > { %s1080_s18 = scalar_select %p854_p11, 1, 0 }
  0x11   : > { %s1081_s19 = scalar_select %p858_p12, 1, 0 }
  0x12   : > { %s633_s21 = sshll.u32 %s782_s9, 10  ;;  %s619_s22 = sshll.u32 %s87_s20, 6 }
  0x13   : > { %s867_s25 = scalar_lea.hbm %s1074_s0, %s633_s21  ;;  %s91_s26 = scalar_lea.vmem [#allocation2], %s619_s22 }
  0x14   : > { %s99_s27 = sshll.u32 %s91_s26, 4  ;;  %p871_p13 = pnand %p648_p10, %p843_p5  ;;  %s875_s27 = int_to_ptr.vmem [resolvable:$true] %s99_s27 }
  0x15   : > { %s877_s29 = scalar_lea.sflag [#allocation3], %s87_s20  ;;  %s690_s30 = scalar_lea.hbm %s867_s25, 1024 }
  0x16   : > { %p691_p0 = scmp.ne.s32.totalorder %s867_s25, %s690_s30  ;;  %p692_p1 = pneg %p871_p13 }
  0x17   : > { %s695_s4 = scalar_lea.hbm %s1074_s0, 2048  ;;  %p696_p4 = scmp.lt.s32.totalorder %s867_s25, %s1074_s0 }
  0x18   : > { %p693_p2 = pnand %p692_p1, %p691_p0  ;;  %p697_p5 = scmp.lt.s32.totalorder %s695_s4, %s690_s30 }
  0x1a   : > { %p694_p3 = pneg %p693_p2  ;;  %p698_p7 = por %p697_p5, %p696_p4 }
  0x1c   : > { %p699_p8 = pnand %p698_p7, %p694_p3 }
  0x1e   : > { %702 = shalt.err (!%p699_p8)
}
  0x1f   : > { %s703_s13 = scalar_lea.vmem %s875_s27, 1024  ;;  %s784_s14 = smov [#allocation2]  }
  0x20   : > { %p704_p10 = scmp.ne.s32.totalorder %s875_s27, %s703_s13  ;;  %s708_s16 = sshll.u32 %s784_s14, 4  ;;  %s709_s16 = int_to_ptr.vmem [resolvable:$false] %s708_s16 }
  0x21   : > { %s710_s20 = scalar_lea.vmem %s709_s16, 2048  ;;  %p711_p2 = scmp.lt.s32.totalorder %s875_s27, %s709_s16 }
  0x22   : > { %p706_p9 = pnand %p704_p10, %p692_p1  ;;  %p712_p12 = scmp.lt.s32.totalorder %s710_s20, %s703_s13 }
  0x24   : > { %p707_p0 = pneg %p706_p9  ;;  %p713_p11 = por %p712_p12, %p711_p2 }
  0x26   : > { %p714_p6 = pnand %p713_p11, %p707_p0 }
  0x28   : > { %717 = shalt.err (!%p714_p6)
}
  0x29   : > { %s785_s21 = smov 128   ;;  %s786_s22 = smov 8  }
  0x2a   : > { %643 = dma.hbm_to_vmem [thread:$0]  (!%p871_p13), %s867_s25, 1024, %s875_s27, %s877_s29, %s785_s21, %s785_s21, %s786_s22  }
  0x2b   : > { %p623_p9 = scmp.ge.s32.totalorder %s782_s9, 1  ;;  %p107_p1 = scmp.lt.s32.totalorder %s782_s9, 3 }
  0x2d   : > { %p108_p3 = pnand %p623_p9, %p107_p1 }
  0x2e   : > { %s901_s23 = sand.u32 (!%p108_p3), 1, %s774_s7   ;;  %p1083_p6 = scmp.ne.s32.totalorder (!%p108_p3), %s1079_s17, 0 }
  0x2f   : > { %111 = sbr.rel (%p108_p3) target bundleno = 384 (0x180), region = 24  ;;  %s624_s24 = sshll.u32 (!%p108_p3), %s901_s23, 6 }
  0x30   : > { %s114_s26 = scalar_lea.sflag (!%p108_p3), [#allocation3], %s901_s23  ;;  %s907_s30 = scalar_lea.vmem (!%p108_p3), [#allocation2], %s624_s24 }
  0x34   : > { %761 = dma.done.wait (%p1083_p6), %s114_s26, 1024  }
  0x35   : > { %763 = vsyncadd (%p1083_p6), %s114_s26, 4294966272  ;;  %v140_v0 = vld [vmem:[%s907_s30 + $0x10] sm:$0xff]  ;;  %v141_v1 = vld [vmem:[%s907_s30 + $0x18] sm:$0xff]  ;;  %vm162_vm0 = vcmask 1040384   ;;  %vm235_vm1 = vcmask 1046528   ;;  %vm288_vm2 = vcmask 1045504  }
  0x36   : > { %v138_v2 = vld [vmem:[%s907_s30] sm:$0xff]  ;;  %v151_v3 = vrot.slane %v140_v0, 1  ;;  %v166_v4 = vrot.slane %v140_v0, 7  ;;  %v167_v5 = vrot.slane %v141_v1, 7  ;;  %v139_v6 = vld [vmem:[%s907_s30 + $0x8] sm:$0xff]  ;;  %v188_v11 = vrot.slane %v141_v1, 5 }
  0x37   : > { %v150_v7 = vrot.slane %v138_v2, 1  ;;  %v918_v8 = vld [vmem:[%s907_s30 + $0x20] sm:$0xff]  ;;  %v163_v9 = vrot.slane %v138_v2, 7  ;;  %v164_v10 = vrot.slane %v139_v6, 7  ;;  %v187_v12 = vrot.slane %v139_v6, 5  ;;  %v143_v13 = vld [vmem:[%s907_s30 + $0x28] sm:$0xff] }
  0x38   : > { %v168_v14 = vsel %vm162_vm0, %v166_v4, %v167_v5  ;;  %v196_v15 = vsel %vm162_vm0, %v151_v3, %v166_v4  ;;  %v169_v16 = vrot.slane %v918_v8, 7  ;;  %v170_v17 = vrot.slane %v143_v13, 7  ;;  %s787_s17 = smov 127   ;;  %v144_v62 = vld [vmem:[%s907_s30 + $0x30] sm:$0xff]  ;;  %v145_v63 = vld [vmem:[%s907_s30 + $0x38] sm:$0xff]  ;;  %s788_s25 = smov 1  }
  0x39   : > { %v205_v18 = vmul.f32 0.25022104, %v196_v15  ;;  %v206_v19 = vmul.f32 0.25022104, %v168_v14  ;;  %v214_v20 = vmul.f32 0.49955794, %v196_v15  ;;  %v165_v21 = vsel %vm162_vm0, %v163_v9, %v164_v10 }
  0x3a   : > { %v215_v22 = vmul.f32 0.49955794, %v168_v14  ;;  %v195_v23 = vsel %vm162_vm0, %v150_v7, %v163_v9  ;;  %v204_v24 = vmul.f32 0.25022104, %v165_v21  ;;  %v212_v25 = vmul.f32 0.49955794, %v165_v21 }
  0x3b   : > { %v241_v26 = vrot.slane %v214_v20, 1  ;;  %v294_v27 = vrot.slane %v205_v18, 2  ;;  %v295_v28 = vrot.slane %v206_v19, 2  ;;  %v203_v29 = vmul.f32 0.25022104, %v195_v23  ;;  %s789_s27 = smov 3  }
  0x3c   : > { %v242_v30 = vrot.slane %v215_v22, 1  ;;  %v211_v31 = vmul.f32 0.49955794, %v195_v23  ;;  %v237_v32 = vrot.slane %v212_v25, 1  ;;  %v290_v33 = vrot.slane %v204_v24, 2  ;;  %s790_s28 = smov 126  }
  0x3d   : > { %v296_v34 = vsel %vm288_vm2, %v294_v27, %v295_v28  ;;  %v289_v35 = vrot.slane %v203_v29, 2  ;;  %v200_v36 = vsel %vm162_vm0, %v167_v5, %v188_v11  ;;  %v199_v37 = vsel %vm162_vm0, %v164_v10, %v187_v12  ;;  %s1006_s29 = scalar_lea.vmem [#allocation5], %s624_s24  ;;  %s635_s2 = sshll.u32 %s825_s10, 10 }
  0x3e   : > { %v243_v38 = vsel %vm235_vm1, %v241_v26, %v242_v30  ;;  %v236_v39 = vrot.slane %v211_v31, 1  ;;  %v216_v40 = vmul.f32 0.49955794, %v200_v36  ;;  %v273_v41 = vmul.f32 0.25022104, %v200_v36  ;;  %s543_s3 = sshll.u32 %s1006_s29, 4  ;;  %s1027_s11 = scalar_lea.hbm %s1075_s1, %s635_s2  ;;  %s1029_s3 = int_to_ptr.vmem [resolvable:$true] %s543_s3 }
  0x3f   : > { %v266_v42 = vadd.f32 %v243_v38, %v205_v18  ;;  %v291_v43 = vsel %vm288_vm2, %v289_v35, %v290_v33  ;;  %v213_v44 = vmul.f32 0.49955794, %v199_v37  ;;  %v272_v45 = vmul.f32 0.25022104, %v199_v37  ;;  %s529_s10 = scalar_lea.sflag [#allocation4], %s901_s23  ;;  %s718_s13 = scalar_lea.vmem %s1029_s3, 1024 }
  0x40   : > { %v238_v46 = vsel %vm235_vm1, %v236_v39, %v237_v32  ;;  %v244_v47 = vrot.slane %v216_v40, 1  ;;  %v297_v48 = vrot.slane %v273_v41, 2  ;;  %v171_v49 = vsel %vm162_vm0, %v169_v16, %v170_v17  ;;  %p719_p11 = scmp.ne.s32.totalorder %s1029_s3, %s718_s13  ;;  %p1084_p12 = scmp.ne.s32.totalorder %s1080_s18, 0 }
  0x41   : > { %v935_v50 = vadd.f32 %v296_v34, %v266_v42  ;;  %v264_v51 = vadd.f32 %v238_v46, %v203_v29  ;;  %v239_v52 = vrot.slane %v213_v44, 1  ;;  %v292_v53 = vrot.slane %v272_v45, 2  ;;  %s791_s14 = smov [#allocation5]  }
  0x42   : > { %v245_v54 = vsel %vm235_vm1, %v242_v30, %v244_v47  ;;  %v298_v55 = vsel %vm288_vm2, %v295_v28, %v297_v48  ;;  %v189_v56 = vrot.slane %v143_v13, 5  ;;  %v208_v57 = vmul.f32 0.25022104, %v171_v49  ;;  %p720_p13 = pnand %p719_p11, %p1084_p12  ;;  %s722_s16 = sshll.u32 %s791_s14, 4  ;;  %s723_s16 = int_to_ptr.vmem [resolvable:$false] %s722_s16 }
  0x43   : > { %337 = vrot.lane.b32.xlu1 %v935_v50, %s787_s17  ;;  %v941_v58 = vadd.f32 %v291_v43, %v264_v51  ;;  %v267_v59 = vadd.f32 %v245_v54, %v206_v19  ;;  %v240_v60 = vsel %vm235_vm1, %v237_v32, %v239_v52  ;;  %v293_v61 = vsel %vm288_vm2, %v290_v33, %v292_v53  ;;  %s724_s20 = scalar_lea.vmem %s723_s16, 2048  ;;  %p725_p5 = scmp.lt.s32.totalorder %s1029_s3, %s723_s16 }
  0x44   : > { %v265_v0 = vadd.f32 %v240_v60, %v204_v24  ;;  %v201_v1 = vsel %vm162_vm0, %v170_v17, %v189_v56  ;;  %v218_v2 = vmul.f32 0.49955794, %v171_v49  ;;  %v300_v3 = vrot.slane %v208_v57, 2  ;;  %p721_p4 = pneg %p720_p13  ;;  %p726_p7 = scmp.lt.s32.totalorder %s724_s20, %s718_s13 }
  0x45   : > { %333 = vrot.lane.b32.xlu0 %v941_v58, %s787_s17  ;;  %v950_v4 = vadd.f32 %v298_v55, %v267_v59  ;;  %v219_v5 = vmul.f32 0.49955794, %v201_v1  ;;  %v274_v6 = vmul.f32 0.25022104, %v201_v1  ;;  %v152_v7 = vrot.slane %v918_v8, 1 }
  0x46   : > { %v318_v9 = vadd.f32 %v293_v61, %v265_v0  ;;  %v247_v10 = vrot.slane %v218_v2, 1  ;;  %v172_v11 = vrot.slane %v144_v62, 7  ;;  %v173_v12 = vrot.slane %v145_v63, 7  ;;  %p727_p8 = por %p726_p7, %p725_p5 }
  0x47   : > { %339 = vrot.lane.b32.xlu1 %v950_v4, %s787_s17  ;;  %v249_v13 = vrot.slane %v219_v5, 1  ;;  %v302_v14 = vrot.slane %v274_v6, 2  ;;  %v197_v15 = vsel %vm162_vm0, %v152_v7, %v169_v16  ;;  %v190_v17 = vrot.slane %v145_v63, 5 }
  0x48   : > { %v207_v18 = vmul.f32 0.25022104, %v197_v15  ;;  %v217_v19 = vmul.f32 0.49955794, %v197_v15  ;;  %v174_v20 = vsel %vm162_vm0, %v172_v11, %v173_v12  ;;  %v153_v21 = vrot.slane %v144_v62, 1  ;;  %p728_p10 = pnand %p727_p8, %p721_p4 }
  0x49   : > { %335 = vrot.lane.b32.xlu0 %v318_v9, %s787_s17  ;;  %v250_v22 = vsel %vm235_vm1, %v247_v10, %v249_v13  ;;  %v303_v23 = vsel %vm288_vm2, %v300_v3, %v302_v14  ;;  %v202_v24 = vsel %vm162_vm0, %v173_v12, %v190_v17  ;;  %v210_v25 = vmul.f32 0.25022104, %v174_v20 }
  0x4a   : > { %v269_v26 = vadd.f32 %v250_v22, %v208_v57  ;;  %v246_v27 = vrot.slane %v217_v19, 1  ;;  %v299_v8 = vrot.slane %v207_v18, 2  ;;  %v221_v28 = vmul.f32 0.49955794, %v174_v20 }
  0x4b   : > { %v222_v16 = vmul.f32 0.49955794, %v202_v24  ;;  %v275_v29 = vmul.f32 0.25022104, %v202_v24  ;;  %v305_v30 = vrot.slane %v210_v25, 2  ;;  %v198_v31 = vsel %vm162_vm0, %v153_v21, %v172_v11 }
  0x4c   : > { %v322_v32 = vadd.f32 %v303_v23, %v269_v26  ;;  %v248_v33 = vsel %vm235_vm1, %v246_v27, %v247_v10  ;;  %v301_v34 = vsel %vm288_vm2, %v299_v8, %v300_v3  ;;  %v252_v35 = vrot.slane %v221_v28, 1 }
  0x4d   : > { %v268_v36 = vadd.f32 %v248_v33, %v207_v18  ;;  %v254_v37 = vrot.slane %v222_v16, 1  ;;  %v307_v38 = vrot.slane %v275_v29, 2  ;;  %v209_v39 = vmul.f32 0.25022104, %v198_v31 }
  0x4e   : > { %343 = vrot.lane.b32.xlu1 %v322_v32, %s787_s17  ;;  %v220_v40 = vmul.f32 0.49955794, %v198_v31  ;;  %vm405_vm3 = vcmask 7168   ;;  %vm414_vm4 = vcmask 138240   ;;  %vm519_vm5 = vcmask 130048  }
  0x4f   : > { %v321_v41 = vadd.f32 %v301_v34, %v268_v36  ;;  %v255_v42 = vsel %vm235_vm1, %v252_v35, %v254_v37  ;;  %v308_v43 = vsel %vm288_vm2, %v305_v30, %v307_v38  ;;  %v304_v44 = vrot.slane %v209_v39, 2 }
  0x50   : > { %v271_v45 = vadd.f32 %v255_v42, %v210_v25  ;;  %v251_v46 = vrot.slane %v220_v40, 1 }
  0x51   : > { %341 = vrot.lane.b32.xlu0 %v321_v41, %s787_s17  ;;  %v306_v49 = vsel %vm288_vm2, %v304_v44, %v305_v30 }
  0x52   : > { %v324_v47 = vadd.f32 %v308_v43, %v271_v45  ;;  %v253_v48 = vsel %vm235_vm1, %v251_v46, %v252_v35 }
  0x53   : > { %v270_v51 = vadd.f32 %v253_v48, %v209_v39 }
  0x54   : > { %347 = vrot.lane.b32.xlu1 %v324_v47, %s787_s17 }
  0x55   : > { %v323_v52 = vadd.f32 %v306_v49, %v270_v51 }
  0x57   : > { %345 = vrot.lane.b32.xlu0 %v323_v52, %s787_s17 }
  0x58   : > { %359 = vrot.lane.b32.xlu1 %v318_v9, %s788_s25 }
  0x5b   : > { %357 = vrot.lane.b32.xlu0 %v941_v58, %s788_s25 }
  0x5c   : > { %363 = vrot.lane.b32.xlu1 %v950_v4, %s788_s25 }
  0x5f   : > { %361 = vrot.lane.b32.xlu0 %v935_v50, %s788_s25 }
  0x60   : > { %367 = vrot.lane.b32.xlu1 %v322_v32, %s788_s25 }
  0x63   : > { %365 = vrot.lane.b32.xlu0 %v321_v41, %s788_s25 }
  0x64   : > { %371 = vrot.lane.b32.xlu1 %v324_v47, %s788_s25 }
  0x67   : > { %369 = vrot.lane.b32.xlu0 %v323_v52, %s788_s25 }
  0x68   : > { %383 = vrot.lane.b32.xlu1 %v318_v9, %s789_s27 }
  0x6b   : > { %381 = vrot.lane.b32.xlu0 %v941_v58, %s789_s27 }
  0x6c   : > { %387 = vrot.lane.b32.xlu1 %v950_v4, %s789_s27 }
  0x6f   : > { %385 = vrot.lane.b32.xlu0 %v935_v50, %s789_s27 }
  0x70   : > { %391 = vrot.lane.b32.xlu1 %v322_v32, %s789_s27 }
  0x73   : > { %389 = vrot.lane.b32.xlu0 %v321_v41, %s789_s27 }
  0x74   : > { %395 = vrot.lane.b32.xlu1 %v324_v47, %s789_s27 }
  0x77   : > { %393 = vrot.lane.b32.xlu0 %v323_v52, %s789_s27 }
  0xb5   : > { %v338_v53 = vpop.permute.xlu1 %337 }
  0xb7   : > { %v334_v54 = vpop.permute.xlu0 %333 }
  0xb9   : > { %v340_v55 = vpop.permute.xlu1 %339 }
  0xbb   : > { %v336_v56 = vpop.permute.xlu0 %335 }
  0xc0   : > { %v344_v57 = vpop.permute.xlu1 %343 }
  0xc3   : > { %v342_v59 = vpop.permute.xlu0 %341 }
  0xc6   : > { %v348_v60 = vpop.permute.xlu1 %347 }
  0xc9   : > { %v346_v61 = vpop.permute.xlu0 %345 }
  0xca   : > { %v360_v62 = vpop.permute.xlu1 %359 }
  0xcb   : > { %v407_v4 = vsel %vm405_vm3, %v336_v56, %v360_v62 }
  0xcd   : > { %v358_v63 = vpop.permute.xlu0 %357 }
  0xce   : > { %v364_v0 = vpop.permute.xlu1 %363  ;;  %v406_v9 = vsel %vm405_vm3, %v334_v54, %v358_v63 }
  0xcf   : > { %v409_v11 = vsel %vm405_vm3, %v340_v55, %v364_v0 }
  0xd1   : > { %v362_v58 = vpop.permute.xlu0 %361 }
  0xd2   : > { %v368_v1 = vpop.permute.xlu1 %367  ;;  %v408_v18 = vsel %vm405_vm3, %v338_v53, %v362_v58 }
  0xd3   : > { %v411_v20 = vsel %vm405_vm3, %v344_v57, %v368_v1 }
  0xd5   : > { %v366_v2 = vpop.permute.xlu0 %365 }
  0xd6   : > { %v372_v3 = vpop.permute.xlu1 %371  ;;  %v410_v26 = vsel %vm405_vm3, %v342_v59, %v366_v2 }
  0xd7   : > { %v413_v8 = vsel %vm405_vm3, %v348_v60, %v372_v3 }
  0xd9   : > { %v370_v50 = vpop.permute.xlu0 %369 }
  0xda   : > { %v384_v5 = vpop.permute.xlu1 %383  ;;  %v412_v32 = vsel %vm405_vm3, %v346_v61, %v370_v50 }
  0xdb   : > { %v416_v6 = vsel %vm414_vm4, %v407_v4, %v384_v5 }
  0xdc   : > { %v432_v7 = vmul.f32 0.49955794, %v416_v6  ;;  %v424_v36 = vmul.f32 0.25022104, %v416_v6 }
  0xdd   : > { %v382_v10 = vpop.permute.xlu0 %381 }
  0xde   : > { %v415_v12 = vsel %vm414_vm4, %v406_v9, %v382_v10  ;;  %v388_v13 = vpop.permute.xlu1 %387  ;;  %449 = vrot.lane.b32.xlu1 %v432_v7, %s787_s17 }
  0xdf   : > { %v431_v14 = vmul.f32 0.49955794, %v415_v12  ;;  %v418_v15 = vsel %vm414_vm4, %v409_v11, %v388_v13  ;;  %v423_v37 = vmul.f32 0.25022104, %v415_v12 }
  0xe0   : > { %v434_v17 = vmul.f32 0.49955794, %v418_v15  ;;  %v426_v38 = vmul.f32 0.25022104, %v418_v15 }
  0xe1   : > { %447 = vrot.lane.b32.xlu0 %v431_v14, %s787_s17  ;;  %v386_v19 = vpop.permute.xlu0 %385 }
  0xe2   : > { %v417_v21 = vsel %vm414_vm4, %v408_v18, %v386_v19  ;;  %v392_v22 = vpop.permute.xlu1 %391  ;;  %453 = vrot.lane.b32.xlu1 %v434_v17, %s787_s17 }
  0xe3   : > { %v433_v23 = vmul.f32 0.49955794, %v417_v21  ;;  %v420_v24 = vsel %vm414_vm4, %v411_v20, %v392_v22  ;;  %v425_v39 = vmul.f32 0.25022104, %v417_v21 }
  0xe4   : > { %v436_v25 = vmul.f32 0.49955794, %v420_v24  ;;  %v428_v40 = vmul.f32 0.25022104, %v420_v24 }
  0xe5   : > { %451 = vrot.lane.b32.xlu0 %v433_v23, %s787_s17  ;;  %v390_v27 = vpop.permute.xlu0 %389 }
  0xe6   : > { %v419_v28 = vsel %vm414_vm4, %v410_v26, %v390_v27  ;;  %v396_v16 = vpop.permute.xlu1 %395  ;;  %457 = vrot.lane.b32.xlu1 %v436_v25, %s787_s17 }
  0xe7   : > { %v435_v29 = vmul.f32 0.49955794, %v419_v28  ;;  %v422_v30 = vsel %vm414_vm4, %v413_v8, %v396_v16  ;;  %v427_v41 = vmul.f32 0.25022104, %v419_v28 }
  0xe8   : > { %v438_v31 = vmul.f32 0.49955794, %v422_v30  ;;  %v430_v42 = vmul.f32 0.25022104, %v422_v30 }
  0xe9   : > { %455 = vrot.lane.b32.xlu0 %v435_v29, %s787_s17  ;;  %v394_v33 = vpop.permute.xlu0 %393 }
  0xea   : > { %v421_v34 = vsel %vm414_vm4, %v412_v32, %v394_v33  ;;  %461 = vrot.lane.b32.xlu1 %v438_v31, %s787_s17 }
  0xeb   : > { %v437_v35 = vmul.f32 0.49955794, %v421_v34  ;;  %v429_v43 = vmul.f32 0.25022104, %v421_v34 }
  0xed   : > { %459 = vrot.lane.b32.xlu0 %v437_v35, %s787_s17 }
  0xee   : > { %489 = vrot.lane.b32.xlu1 %v424_v36, %s790_s28 }
  0xf1   : > { %487 = vrot.lane.b32.xlu0 %v423_v37, %s790_s28 }
  0xf2   : > { %493 = vrot.lane.b32.xlu1 %v426_v38, %s790_s28 }
  0xf5   : > { %491 = vrot.lane.b32.xlu0 %v425_v39, %s790_s28 }
  0xf6   : > { %497 = vrot.lane.b32.xlu1 %v428_v40, %s790_s28 }
  0xf9   : > { %495 = vrot.lane.b32.xlu0 %v427_v41, %s790_s28 }
  0xfa   : > { %501 = vrot.lane.b32.xlu1 %v430_v42, %s790_s28 }
  0xfd   : > { %499 = vrot.lane.b32.xlu0 %v429_v43, %s790_s28 }
 0x150   : > { %v450_v44 = vpop.permute.xlu1 %449 }
 0x151   : > { %v472_v52 = vadd.f32 %v450_v44, %v424_v36 }
 0x153   : > { %v448_v45 = vpop.permute.xlu0 %447 }
 0x154   : > { %v454_v46 = vpop.permute.xlu1 %453  ;;  %v471_v56 = vadd.f32 %v448_v45, %v423_v37 }
 0x155   : > { %v474_v57 = vadd.f32 %v454_v46, %v426_v38 }
 0x157   : > { %v452_v47 = vpop.permute.xlu0 %451 }
 0x158   : > { %v458_v48 = vpop.permute.xlu1 %457  ;;  %v473_v63 = vadd.f32 %v452_v47, %v425_v39 }
 0x159   : > { %v476_v0 = vadd.f32 %v458_v48, %v428_v40 }
 0x15b   : > { %v456_v49 = vpop.permute.xlu0 %455 }
 0x15c   : > { %v462_v51 = vpop.permute.xlu1 %461  ;;  %v475_v50 = vadd.f32 %v456_v49, %v427_v41 }
 0x15d   : > { %v478_v4 = vadd.f32 %v462_v51, %v430_v42 }
 0x15f   : > { %v460_v53 = vpop.permute.xlu0 %459 }
 0x160   : > { %v490_v54 = vpop.permute.xlu1 %489  ;;  %v477_v10 = vadd.f32 %v460_v53, %v429_v43 }
 0x161   : > { %v512_v55 = vadd.f32 %v490_v54, %v472_v52 }
 0x163   : > { %521 = vst.msk [vmem:[%s1006_s29 + $0x8] sm:$0xff] %vm519_vm5, %v512_v55  ;;  %v488_v59 = vpop.permute.xlu0 %487 }
 0x164   : > { %v511_v60 = vadd.f32 %v488_v59, %v471_v56  ;;  %v494_v61 = vpop.permute.xlu1 %493 }
 0x165   : > { %v514_v62 = vadd.f32 %v494_v61, %v474_v57 }
 0x166   : > { %520 = vst.msk [vmem:[%s1006_s29] sm:$0xff] %vm519_vm5, %v511_v60 }
 0x167   : > { %523 = vst.msk [vmem:[%s1006_s29 + $0x18] sm:$0xff] %vm519_vm5, %v514_v62  ;;  %v492_v58 = vpop.permute.xlu0 %491 }
 0x168   : > { %v513_v1 = vadd.f32 %v492_v58, %v473_v63  ;;  %v498_v2 = vpop.permute.xlu1 %497 }
 0x169   : > { %v516_v3 = vadd.f32 %v498_v2, %v476_v0 }
 0x16a   : > { %522 = vst.msk [vmem:[%s1006_s29 + $0x10] sm:$0xff] %vm519_vm5, %v513_v1 }
 0x16b   : > { %525 = vst.msk [vmem:[%s1006_s29 + $0x28] sm:$0xff] %vm519_vm5, %v516_v3  ;;  %v496_v5 = vpop.permute.xlu0 %495 }
 0x16c   : > { %v515_v6 = vadd.f32 %v496_v5, %v475_v50  ;;  %v502_v7 = vpop.permute.xlu1 %501 }
 0x16d   : > { %v518_v9 = vadd.f32 %v502_v7, %v478_v4 }
 0x16e   : > { %524 = vst.msk [vmem:[%s1006_s29 + $0x20] sm:$0xff] %vm519_vm5, %v515_v6 }
 0x16f   : > { %527 = vst.msk [vmem:[%s1006_s29 + $0x38] sm:$0xff] %vm519_vm5, %v518_v9  ;;  %v500_v11 = vpop.permute.xlu0 %499 }
 0x170   : > { %v517_v12 = vadd.f32 %v500_v11, %v477_v10 }
 0x172   : > { %526 = vst.msk [vmem:[%s1006_s29 + $0x30] sm:$0xff] %vm519_vm5, %v517_v12 }
 0x173   : > { %731 = shalt.err (!%p728_p10)
}
 0x174   : > { %s732_s21 = scalar_lea.hbm %s1027_s11, 1024  ;;  %s736_s26 = scalar_lea.hbm %s1075_s1, 2048 }
 0x175   : > { %p733_p0 = scmp.ne.s32.totalorder %s1027_s11, %s732_s21  ;;  %p737_p1 = scmp.lt.s32.totalorder %s1027_s11, %s1075_s1 }
 0x176   : > { %p738_p3 = scmp.lt.s32.totalorder %s736_s26, %s732_s21 }
 0x177   : > { %p734_p2 = pnand %p733_p0, %p1084_p12 }
 0x178   : > { %p739_p6 = por %p738_p3, %p737_p1 }
 0x179   : > { %p735_p9 = pneg %p734_p2 }
 0x17b   : > { %p740_p11 = pnand %p739_p6, %p735_p9 }
 0x17d   : > { %743 = shalt.err (!%p740_p11)
}
 0x17e   : > { %s792_s25 = smov 128   ;;  %s793_s27 = smov 8  }
 0x17f   : > { %638 = dma.vmem_to_hbm [thread:$0]  (%p1084_p12), %s1029_s3, 1024, %s1027_s11, %s529_s10, %s792_s25, %s792_s25, %s793_s27  }
 0x180 PF: > { %s558_s28 = sand.u32 1, %s770_s6   ;;  %p1085_p13 = scmp.ne.s32.totalorder %s1081_s19, 0 }
 0x181   : > { %p1086_p4 = scmp.ge.s32.totalorder %s782_s9, 2  ;;  %s559_s29 = scalar_lea.sflag [#allocation4], %s558_s28 }
 0x183   : > { %p645_p5 = pnand %p1086_p4, %p1085_p13 }
 0x185   : > { %p646_p7 = pneg %p645_p5 }
 0x187   : > { %765 = dma.done.wait (%p646_p7), %s559_s29, 1024  }
 0x188   : > { %767 = vsyncadd (%p646_p7), %s559_s29, 4294966272  ;;  %p14_p8 = scmp.ge.s32.totalorder %s829_s12, 4   ;;  %s1087_s6 = smov %s774_s7 }
 0x189   : > { %s1088_s7 = smov %s778_s8  ;;  %s1089_s8 = smov %s841_s15 }
 0x18a   : > { %s1090_s9 = smov %s829_s12  ;;  %16 = sbr.rel (!%p14_p8) target bundleno = 5 (0x5), region = 69 }
 0x18f   :  { %564 = vsyncpa [#allocation3], 1 }
 0x190   :  { %566 = vsyncpa [#allocation3 + $0x1], 1 }
 0x191   :  { %567 = vsyncpa [#allocation4], 1 }
 0x192   :  { %569 = vsyncpa [#allocation4 + $0x1], 1 }

</bundles_post_ra>
